<compile_context>
chip_gen: v5e
topology: v5e:2x2
jax: 0.10.0
libtpu: 0.0.40
codegen_flags: <defaults>
</compile_context>

<pallas_src>
import functools
import math

import jax
import jax.numpy as jnp
from jax import lax
from jax.experimental import pallas as pl
from jax.experimental.pallas import tpu as pltpu


# --------------------------------------------------------------------------
# Fused Pallas kernel: per-channel-tap depthwise KxK conv on a folded (W*C)
# lane axis (channels minor).
# --------------------------------------------------------------------------
def _mixconv_kernel(Nb, K, pad, H, W, Ho, Wo, C, row_chunk, hoist_taps,
                    x_ref, w_ref, o_ref, scr_ref):
    """x_ref  : (Nb, H, W*C)        VMEM input tile, (W, C) folded, C minor.
       w_ref  : (K*K, Wo*C)         VMEM f32 taps, tiled along the folded axis.
       o_ref  : (Nb, Ho, Wo*C)      VMEM output tile.
       scr_ref: (Nb, H+2p, (W+2p)*C) VMEM halo buffer (input dtype)."""
    Hp = H + 2 * pad
    WpC = (W + 2 * pad) * C
    WC = W * C
    WoC = Wo * C
    dt = scr_ref.dtype

    # Build the halo: zero only the four thin border strips (not the whole
    # scratch) each step, then write the interior once.  This is megacore-safe
    # (no reliance on scratch persistence across grid steps split over cores).
    if pad > 0:
        scr_ref[:, :pad, :] = jnp.zeros((Nb, pad, WpC), dt)
        scr_ref[:, pad + H:, :] = jnp.zeros((Nb, pad, WpC), dt)
        scr_ref[:, pad:pad + H, :pad * C] = jnp.zeros((Nb, H, pad * C), dt)
        scr_ref[:, pad:pad + H, pad * C + WC:] = jnp.zeros((Nb, H, pad * C), dt)
    scr_ref[:, pad:pad + H, pad * C:pad * C + WC] = x_ref[...]

    # Tap loads hoisted out of the row-chunk loop (one VMEM load per tap per
    # grid step).  For very wide folded axes the full tap set would not fit the
    # vreg file, so fall back to loading at the point of use.
    if hoist_taps:
        taps = [w_ref[i] for i in range(K * K)]
        tap = lambda i: taps[i]
    else:
        tap = lambda i: w_ref[i]

    # K*K shifted multiply-accumulates: a dx shift is a lane shift of dx*C on
    # the folded axis.  Chunked over output rows so the accumulator stays a
    # bounded number of vregs.
    for n in range(Nb):
        for h0 in range(0, Ho, row_chunk):
            hc = min(row_chunk, Ho - h0)
            acc = jnp.zeros((hc, WoC), jnp.float32)
            for dy in range(K):
                for dx in range(K):
                    win = scr_ref[n, h0 + dy:h0 + dy + hc, dx * C:dx * C + WoC]
                    acc = acc + win.astype(jnp.float32) * tap(dy * K + dx)
            o_ref[n, h0:h0 + hc, :] = acc.astype(o_ref.dtype)


# --------------------------------------------------------------------------
# MixConv forward (faithful to the PyTorch module, quirks included).
# --------------------------------------------------------------------------
def mixconv_forward(x, weights, kernels):
    """x      : (N, C_in, H, W)
       weights: list of (C_split, 1, k, k) depthwise weights (one per branch)
       kernels: list of kernel sizes
       returns: (num_splits * N, C_split, Ho, Wo)   [== torch.cat(branch outs, 0)]"""
    num_splits = len(kernels)
    N, C_in, H, W = x.shape
    C_split = C_in // num_splits

    # The PyTorch module only runs without error when every chunk produced by
    # torch.split(..., split_size_or_sections=num_splits) that a branch consumes
    # has exactly C_split channels; for num_splits > 1 that means
    # C_in // num_splits == num_splits.  Reproduce that contract.
    if num_splits > 1 and C_split != num_splits:
        raise ValueError("invalid MixConv config (the PyTorch module would raise): "
                         f"in_channels={C_in}, num_splits={num_splits}")
    for w, k in zip(weights, kernels):
        if w.shape != (C_split, 1, k, k):
            raise ValueError(f"weight shape {w.shape} != {(C_split, 1, k, k)}")
    # TODO(synk): only the depthwise (multiplier-1) case is implemented, i.e.
    # in_channels == out_channels per split, as in the reference test config.

    K = max(kernels)
    if any((K - k) % 2 for k in kernels):
        # Mixed-parity kernel sizes give mismatched spatial sizes in the original
        # module too (torch.cat would fail), so this is not a real configuration.
        raise ValueError("all MixConv kernel sizes must have the same parity")
    pad = K // 2
    Ho = H + 2 * pad - K + 1
    Wo = W + 2 * pad - K + 1
    C = num_splits * C_split               # channels actually consumed (zip truncation)

    # ---- layout plumbing (outside the kernel) ------------------------------
    # NCHW -> (N, H, W*C) with channels minor on the folded lane axis.
    x_f = jnp.transpose(x[:, :C], (0, 2, 3, 1)).reshape(N, H, W * C)

    # Per-channel taps: each branch's k x k kernel zero-padded (centered) to K x K
    # (conv(K, pad=K//2) with the padded taps == conv(k, pad=k//2) exactly), then
    # tiled Wo times along the folded lane axis -> (K*K, Wo*C) f32.
    per_branch = []
    for w, k in zip(weights, kernels):
        m = (K - k) // 2
        per_branch.append(jnp.pad(w.astype(jnp.float32)[:, 0],
                                  ((0, 0), (m, m), (m, m))))
    w_all = jnp.concatenate(per_branch, axis=0)                 # (C, K, K)
    taps_ck = jnp.transpose(w_all, (1, 2, 0)).reshape(K * K, C) # [dy*K+dx, c]
    w_taps = jnp.tile(taps_ck, (1, Wo))                         # (K*K, Wo*C)

    # ---- tiling heuristics ---------------------------------------------------
    lane_tiles = -(-(Wo * C) // 128)                 # vregs per accumulator row-tile
    row_chunk = min(Ho, 8 * max(1, 24 // lane_tiles))  # keep acc <= ~24 vregs
    hoist_taps = (K * K * lane_tiles) <= 32          # keep hoisted taps in the vreg file
    # TODO(synk): for very large H*W*C images add a row-tile grid axis (halo via
    # overlapping index_map) and/or raise vmem_limit_bytes; the realistic MixConv
    # configs (tiny C for multi-branch, 8x8/16x16 boards) fit the defaults.

    # Images per grid step: amortize the ~0.35us/step fixed cost for small
    # images, but keep the grid extent >= 2 when N >= 2 (v7x has 2 TensorCores).
    itemsize = jnp.dtype(x.dtype).itemsize
    per_image = H * W * C * itemsize
    cap = max(1, (512 * 1024) // max(per_image, 1))
    divs = [d for d in range(1, N + 1) if N % d == 0 and d <= cap]
    cands = [d for d in divs if N // d >= 2] or divs or [1]
    Nb = max(cands)
    G = N // Nb

    # ---- single fused Pallas call --------------------------------------------
    kernel = functools.partial(_mixconv_kernel, Nb, K, pad, H, W, Ho, Wo, C,
                               row_chunk, hoist_taps)

    grid_spec = pltpu.PrefetchScalarGridSpec(
        num_scalar_prefetch=0,
        grid=(G,),
        in_specs=[
            pl.BlockSpec((Nb, H, W * C), lambda g: (g, 0, 0)),
            pl.BlockSpec((K * K, Wo * C), lambda g: (0, 0)),
        ],
        out_specs=pl.BlockSpec((Nb, Ho, Wo * C), lambda g: (g, 0, 0)),
        scratch_shapes=[
            pltpu.VMEM((Nb, H + 2 * pad, (W + 2 * pad) * C), x.dtype),
        ],
    )

    y = pl.pallas_call(
        kernel,
        out_shape=jax.ShapeDtypeStruct((N, Ho, Wo * C), x.dtype),
        grid_spec=grid_spec,
        compiler_params=pltpu.CompilerParams(
            dimension_semantics=("parallel",),
        ),
    )(x_f, w_taps)

    # Regroup to the module's output: torch.cat of per-branch NCHW outputs along
    # the batch axis.
    y = y.reshape(N, Ho, Wo, C)
    y = jnp.transpose(y, (0, 3, 1, 2))                          # (N, C, Ho, Wo)
    y = y.reshape(N, num_splits, C_split, Ho, Wo)
    y = jnp.transpose(y, (1, 0, 2, 3, 4))
    return y.reshape(num_splits * N, C_split, Ho, Wo)


# --------------------------------------------------------------------------
# Pure-JAX reference (for correctness check only) — mirrors torch quirks.
# --------------------------------------------------------------------------
def _torch_like_split(x, size, axis=1):
    n = x.shape[axis]
    chunks, i = [], 0
    while i < n:
        chunks.append(lax.slice_in_dim(x, i, min(i + size, n), axis=axis))
        i += size
    return chunks


def _ref_branch(x, w, k):
    pad = k // 2
    return lax.conv_general_dilated(
        x, w, window_strides=(1, 1), padding=((pad, pad), (pad, pad)),
        dimension_numbers=("NCHW", "OIHW", "NCHW"),
        feature_group_count=x.shape[1])


def mixconv_reference(x, weights, kernels):
    num_splits = len(kernels)
    if num_splits == 1:
        return _ref_branch(x, weights[0], kernels[0])
    splits = _torch_like_split(x, num_splits, axis=1)
    outs = [_ref_branch(xi, w, k)
            for xi, (w, k) in zip(splits, zip(weights, kernels))]
    return jnp.concatenate(outs, axis=0)


if __name__ == "__main__":
    # MixConv(in_channels=4, out_channels=4, kernels=[3, 5]) -> num_splits=2,
    # each branch: depthwise Conv2d(2, 2, k, padding=k//2, groups=2, bias=False).
    in_channels = 4
    out_channels = 4
    kernels = [3, 5]
    num_splits = len(kernels)
    N, H, W = 2, 16, 16

    key = jax.random.PRNGKey(0)
    kx, *kws = jax.random.split(key, 1 + num_splits)

    x = jax.random.normal(kx, (N, in_channels, H, W), dtype=jnp.float32)

    # Deterministic weight init (kaiming-uniform-like bound = 1/sqrt(fan_in)).
    weights = []
    c_split = out_channels // num_splits
    for kw, k in zip(kws, kernels):
        bound = 1.0 / math.sqrt(1 * k * k)
        w = jax.random.uniform(kw, (c_split, 1, k, k), dtype=jnp.float32,
                               minval=-bound, maxval=bound)
        weights.append(w)

    out = mixconv_forward(x, weights, kernels)
    out = jax.block_until_ready(out)

    ref = jax.block_until_ready(mixconv_reference(x, weights, kernels))
    assert out.shape == (N * num_splits, out_channels // num_splits, H, W), out.shape
    assert jnp.max(jnp.abs(out - ref)) < 1e-4, float(jnp.max(jnp.abs(out - ref)))

    print("KERNEL_OK")
</pallas_src>

<mosaic_0001>
module attributes {stable_mosaic.version = 11 : i64} {
  func.func @_mixconv_kernel(%arg0: i32, %arg1: memref<1x16x64xf32, #tpu.memory_space<vmem>>, %arg2: memref<25x64xf32, #tpu.memory_space<vmem>>, %arg3: memref<1x16x64xf32, #tpu.memory_space<vmem>>, %arg4: memref<1x20x80xf32, #tpu.memory_space<vmem>>) attributes {dimension_semantics = [#tpu.dimension_semantics<parallel>], iteration_bounds = array<i64: 2>, scalar_prefetch = 0 : i64, scratch_operands = 1 : i64, tpu.core_type = #tpu.core_type<tc>, window_params = [{transform_indices = @transform_0, window_bounds = array<i64: 1, 16, 64>}, {pipeline_mode = #tpu.pipeline_mode<synchronous>, transform_indices = @transform_1, window_bounds = array<i64: 25, 64>}, {transform_indices = @transform_2, window_bounds = array<i64: 1, 16, 64>}]} {
    %cst = arith.constant 0.000000e+00 : f32
    %0 = vector.broadcast %cst : f32 to vector<1x2x80xf32>
    %c0 = arith.constant 0 : index
    %c0_0 = arith.constant 0 : index
    %c0_1 = arith.constant 0 : index
    %1 = vector.load %arg4[%c0, %c0_0, %c0_1] : memref<1x20x80xf32, #tpu.memory_space<vmem>>, vector<1x2x80xf32>
    tpu.vector_store %arg4[%c0, %c0_0, %c0_1], %0 {strides = array<i32>} : memref<1x20x80xf32, #tpu.memory_space<vmem>>, vector<1x2x80xf32>,
    %cst_2 = arith.constant 0.000000e+00 : f32
    %2 = vector.broadcast %cst_2 : f32 to vector<1x2x80xf32>
    %c0_3 = arith.constant 0 : index
    %c18 = arith.constant 18 : index
    %c0_4 = arith.constant 0 : index
    %3 = vector.load %arg4[%c0_3, %c18, %c0_4] : memref<1x20x80xf32, #tpu.memory_space<vmem>>, vector<1x2x80xf32>
    tpu.vector_store %arg4[%c0_3, %c18, %c0_4], %2 {strides = array<i32>} : memref<1x20x80xf32, #tpu.memory_space<vmem>>, vector<1x2x80xf32>,
    %cst_5 = arith.constant 0.000000e+00 : f32
    %4 = vector.broadcast %cst_5 : f32 to vector<1x16x8xf32>
    %c0_6 = arith.constant 0 : index
    %c2 = arith.constant 2 : index
    %c0_7 = arith.constant 0 : index
    %5 = vector.load %arg4[%c0_6, %c2, %c0_7] : memref<1x20x80xf32, #tpu.memory_space<vmem>>, vector<1x16x8xf32>
    tpu.vector_store %arg4[%c0_6, %c2, %c0_7], %4 {strides = array<i32>} : memref<1x20x80xf32, #tpu.memory_space<vmem>>, vector<1x16x8xf32>,
    %cst_8 = arith.constant 0.000000e+00 : f32
    %6 = vector.broadcast %cst_8 : f32 to vector<1x16x8xf32>
    %c0_9 = arith.constant 0 : index
    %c2_10 = arith.constant 2 : index
    %c72 = arith.constant 72 : index
    %7 = vector.load %arg4[%c0_9, %c2_10, %c72] : memref<1x20x80xf32, #tpu.memory_space<vmem>>, vector<1x16x8xf32>
    tpu.vector_store %arg4[%c0_9, %c2_10, %c72], %6 {strides = array<i32>} : memref<1x20x80xf32, #tpu.memory_space<vmem>>, vector<1x16x8xf32>,
    %c0_11 = arith.constant 0 : index
    %c0_12 = arith.constant 0 : index
    %c0_13 = arith.constant 0 : index
    %8 = vector.load %arg1[%c0_11, %c0_12, %c0_13] : memref<1x16x64xf32, #tpu.memory_space<vmem>>, vector<1x16x64xf32>
    %c0_14 = arith.constant 0 : index
    %c2_15 = arith.constant 2 : index
    %c8 = arith.constant 8 : index
    %9 = vector.load %arg4[%c0_14, %c2_15, %c8] : memref<1x20x80xf32, #tpu.memory_space<vmem>>, vector<1x16x64xf32>
    tpu.vector_store %arg4[%c0_14, %c2_15, %c8], %8 {strides = array<i32>} : memref<1x20x80xf32, #tpu.memory_space<vmem>>, vector<1x16x64xf32>,
    %c0_16 = arith.constant 0 : index
    %c0_17 = arith.constant 0 : index
    %10 = vector.load %arg2[%c0_16, %c0_17] : memref<25x64xf32, #tpu.memory_space<vmem>>, vector<1x64xf32>
    %11 = vector.shape_cast %10 : vector<1x64xf32> to vector<64xf32>
    %c1 = arith.constant 1 : index
    %c0_18 = arith.constant 0 : index
    %12 = vector.load %arg2[%c1, %c0_18] : memref<25x64xf32, #tpu.memory_space<vmem>>, vector<1x64xf32>
    %13 = vector.shape_cast %12 : vector<1x64xf32> to vector<64xf32>
    %c2_19 = arith.constant 2 : index
    %c0_20 = arith.constant 0 : index
    %14 = vector.load %arg2[%c2_19, %c0_20] : memref<25x64xf32, #tpu.memory_space<vmem>>, vector<1x64xf32>
    %15 = vector.shape_cast %14 : vector<1x64xf32> to vector<64xf32>
    %c3 = arith.constant 3 : index
    %c0_21 = arith.constant 0 : index
    %16 = vector.load %arg2[%c3, %c0_21] : memref<25x64xf32, #tpu.memory_space<vmem>>, vector<1x64xf32>
    %17 = vector.shape_cast %16 : vector<1x64xf32> to vector<64xf32>
    %c4 = arith.constant 4 : index
    %c0_22 = arith.constant 0 : index
    %18 = vector.load %arg2[%c4, %c0_22] : memref<25x64xf32, #tpu.memory_space<vmem>>, vector<1x64xf32>
    %19 = vector.shape_cast %18 : vector<1x64xf32> to vector<64xf32>
    %c5 = arith.constant 5 : index
    %c0_23 = arith.constant 0 : index
    %20 = vector.load %arg2[%c5, %c0_23] : memref<25x64xf32, #tpu.memory_space<vmem>>, vector<1x64xf32>
    %21 = vector.shape_cast %20 : vector<1x64xf32> to vector<64xf32>
    %c6 = arith.constant 6 : index
    %c0_24 = arith.constant 0 : index
    %22 = vector.load %arg2[%c6, %c0_24] : memref<25x64xf32, #tpu.memory_space<vmem>>, vector<1x64xf32>
    %23 = vector.shape_cast %22 : vector<1x64xf32> to vector<64xf32>
    %c7 = arith.constant 7 : index
    %c0_25 = arith.constant 0 : index
    %24 = vector.load %arg2[%c7, %c0_25] : memref<25x64xf32, #tpu.memory_space<vmem>>, vector<1x64xf32>
    %25 = vector.shape_cast %24 : vector<1x64xf32> to vector<64xf32>
    %c8_26 = arith.constant 8 : index
    %c0_27 = arith.constant 0 : index
    %26 = vector.load %arg2[%c8_26, %c0_27] : memref<25x64xf32, #tpu.memory_space<vmem>>, vector<1x64xf32>
    %27 = vector.shape_cast %26 : vector<1x64xf32> to vector<64xf32>
    %c9 = arith.constant 9 : index
    %c0_28 = arith.constant 0 : index
    %28 = vector.load %arg2[%c9, %c0_28] : memref<25x64xf32, #tpu.memory_space<vmem>>, vector<1x64xf32>
    %29 = vector.shape_cast %28 : vector<1x64xf32> to vector<64xf32>
    %c10 = arith.constant 10 : index
    %c0_29 = arith.constant 0 : index
    %30 = vector.load %arg2[%c10, %c0_29] : memref<25x64xf32, #tpu.memory_space<vmem>>, vector<1x64xf32>
    %31 = vector.shape_cast %30 : vector<1x64xf32> to vector<64xf32>
    %c11 = arith.constant 11 : index
    %c0_30 = arith.constant 0 : index
    %32 = vector.load %arg2[%c11, %c0_30] : memref<25x64xf32, #tpu.memory_space<vmem>>, vector<1x64xf32>
    %33 = vector.shape_cast %32 : vector<1x64xf32> to vector<64xf32>
    %c12 = arith.constant 12 : index
    %c0_31 = arith.constant 0 : index
    %34 = vector.load %arg2[%c12, %c0_31] : memref<25x64xf32, #tpu.memory_space<vmem>>, vector<1x64xf32>
    %35 = vector.shape_cast %34 : vector<1x64xf32> to vector<64xf32>
    %c13 = arith.constant 13 : index
    %c0_32 = arith.constant 0 : index
    %36 = vector.load %arg2[%c13, %c0_32] : memref<25x64xf32, #tpu.memory_space<vmem>>, vector<1x64xf32>
    %37 = vector.shape_cast %36 : vector<1x64xf32> to vector<64xf32>
    %c14 = arith.constant 14 : index
    %c0_33 = arith.constant 0 : index
    %38 = vector.load %arg2[%c14, %c0_33] : memref<25x64xf32, #tpu.memory_space<vmem>>, vector<1x64xf32>
    %39 = vector.shape_cast %38 : vector<1x64xf32> to vector<64xf32>
    %c15 = arith.constant 15 : index
    %c0_34 = arith.constant 0 : index
    %40 = vector.load %arg2[%c15, %c0_34] : memref<25x64xf32, #tpu.memory_space<vmem>>, vector<1x64xf32>
    %41 = vector.shape_cast %40 : vector<1x64xf32> to vector<64xf32>
    %c16 = arith.constant 16 : index
    %c0_35 = arith.constant 0 : index
    %42 = vector.load %arg2[%c16, %c0_35] : memref<25x64xf32, #tpu.memory_space<vmem>>, vector<1x64xf32>
    %43 = vector.shape_cast %42 : vector<1x64xf32> to vector<64xf32>
    %c17 = arith.constant 17 : index
    %c0_36 = arith.constant 0 : index
    %44 = vector.load %arg2[%c17, %c0_36] : memref<25x64xf32, #tpu.memory_space<vmem>>, vector<1x64xf32>
    %45 = vector.shape_cast %44 : vector<1x64xf32> to vector<64xf32>
    %c18_37 = arith.constant 18 : index
    %c0_38 = arith.constant 0 : index
    %46 = vector.load %arg2[%c18_37, %c0_38] : memref<25x64xf32, #tpu.memory_space<vmem>>, vector<1x64xf32>
    %47 = vector.shape_cast %46 : vector<1x64xf32> to vector<64xf32>
    %c19 = arith.constant 19 : index
    %c0_39 = arith.constant 0 : index
    %48 = vector.load %arg2[%c19, %c0_39] : memref<25x64xf32, #tpu.memory_space<vmem>>, vector<1x64xf32>
    %49 = vector.shape_cast %48 : vector<1x64xf32> to vector<64xf32>
    %c20 = arith.constant 20 : index
    %c0_40 = arith.constant 0 : index
    %50 = vector.load %arg2[%c20, %c0_40] : memref<25x64xf32, #tpu.memory_space<vmem>>, vector<1x64xf32>
    %51 = vector.shape_cast %50 : vector<1x64xf32> to vector<64xf32>
    %c21 = arith.constant 21 : index
    %c0_41 = arith.constant 0 : index
    %52 = vector.load %arg2[%c21, %c0_41] : memref<25x64xf32, #tpu.memory_space<vmem>>, vector<1x64xf32>
    %53 = vector.shape_cast %52 : vector<1x64xf32> to vector<64xf32>
    %c22 = arith.constant 22 : index
    %c0_42 = arith.constant 0 : index
    %54 = vector.load %arg2[%c22, %c0_42] : memref<25x64xf32, #tpu.memory_space<vmem>>, vector<1x64xf32>
    %55 = vector.shape_cast %54 : vector<1x64xf32> to vector<64xf32>
    %c23 = arith.constant 23 : index
    %c0_43 = arith.constant 0 : index
    %56 = vector.load %arg2[%c23, %c0_43] : memref<25x64xf32, #tpu.memory_space<vmem>>, vector<1x64xf32>
    %57 = vector.shape_cast %56 : vector<1x64xf32> to vector<64xf32>
    %c24 = arith.constant 24 : index
    %c0_44 = arith.constant 0 : index
    %58 = vector.load %arg2[%c24, %c0_44] : memref<25x64xf32, #tpu.memory_space<vmem>>, vector<1x64xf32>
    %59 = vector.shape_cast %58 : vector<1x64xf32> to vector<64xf32>
    %cst_45 = arith.constant 0.000000e+00 : f32
    %60 = vector.broadcast %cst_45 : f32 to vector<16x64xf32>
    %c0_46 = arith.constant 0 : index
    %c0_47 = arith.constant 0 : index
    %c0_48 = arith.constant 0 : index
    %61 = vector.load %arg4[%c0_46, %c0_47, %c0_48] : memref<1x20x80xf32, #tpu.memory_space<vmem>>, vector<1x16x64xf32>
    %62 = vector.shape_cast %61 : vector<1x16x64xf32> to vector<16x64xf32>
    %63 = vector.shape_cast %11 : vector<64xf32> to vector<1x64xf32>
    %64 = vector.broadcast %63 : vector<1x64xf32> to vector<16x64xf32>
    %65 = arith.mulf %62, %64 : vector<16x64xf32>
    %66 = arith.addf %60, %65 : vector<16x64xf32>
    %c0_49 = arith.constant 0 : index
    %c0_50 = arith.constant 0 : index
    %c4_51 = arith.constant 4 : index
    %67 = vector.load %arg4[%c0_49, %c0_50, %c4_51] : memref<1x20x80xf32, #tpu.memory_space<vmem>>, vector<1x16x64xf32>
    %68 = vector.shape_cast %67 : vector<1x16x64xf32> to vector<16x64xf32>
    %69 = vector.shape_cast %13 : vector<64xf32> to vector<1x64xf32>
    %70 = vector.broadcast %69 : vector<1x64xf32> to vector<16x64xf32>
    %71 = arith.mulf %68, %70 : vector<16x64xf32>
    %72 = arith.addf %66, %71 : vector<16x64xf32>
    %c0_52 = arith.constant 0 : index
    %c0_53 = arith.constant 0 : index
    %c8_54 = arith.constant 8 : index
    %73 = vector.load %arg4[%c0_52, %c0_53, %c8_54] : memref<1x20x80xf32, #tpu.memory_space<vmem>>, vector<1x16x64xf32>
    %74 = vector.shape_cast %73 : vector<1x16x64xf32> to vector<16x64xf32>
    %75 = vector.shape_cast %15 : vector<64xf32> to vector<1x64xf32>
    %76 = vector.broadcast %75 : vector<1x64xf32> to vector<16x64xf32>
    %77 = arith.mulf %74, %76 : vector<16x64xf32>
    %78 = arith.addf %72, %77 : vector<16x64xf32>
    %c0_55 = arith.constant 0 : index
    %c0_56 = arith.constant 0 : index
    %c12_57 = arith.constant 12 : index
    %79 = vector.load %arg4[%c0_55, %c0_56, %c12_57] : memref<1x20x80xf32, #tpu.memory_space<vmem>>, vector<1x16x64xf32>
    %80 = vector.shape_cast %79 : vector<1x16x64xf32> to vector<16x64xf32>
    %81 = vector.shape_cast %17 : vector<64xf32> to vector<1x64xf32>
    %82 = vector.broadcast %81 : vector<1x64xf32> to vector<16x64xf32>
    %83 = arith.mulf %80, %82 : vector<16x64xf32>
    %84 = arith.addf %78, %83 : vector<16x64xf32>
    %c0_58 = arith.constant 0 : index
    %c0_59 = arith.constant 0 : index
    %c16_60 = arith.constant 16 : index
    %85 = vector.load %arg4[%c0_58, %c0_59, %c16_60] : memref<1x20x80xf32, #tpu.memory_space<vmem>>, vector<1x16x64xf32>
    %86 = vector.shape_cast %85 : vector<1x16x64xf32> to vector<16x64xf32>
    %87 = vector.shape_cast %19 : vector<64xf32> to vector<1x64xf32>
    %88 = vector.broadcast %87 : vector<1x64xf32> to vector<16x64xf32>
    %89 = arith.mulf %86, %88 : vector<16x64xf32>
    %90 = arith.addf %84, %89 : vector<16x64xf32>
    %c0_61 = arith.constant 0 : index
    %c1_62 = arith.constant 1 : index
    %c0_63 = arith.constant 0 : index
    %91 = vector.load %arg4[%c0_61, %c1_62, %c0_63] : memref<1x20x80xf32, #tpu.memory_space<vmem>>, vector<1x16x64xf32>
    %92 = vector.shape_cast %91 : vector<1x16x64xf32> to vector<16x64xf32>
    %93 = vector.shape_cast %21 : vector<64xf32> to vector<1x64xf32>
    %94 = vector.broadcast %93 : vector<1x64xf32> to vector<16x64xf32>
    %95 = arith.mulf %92, %94 : vector<16x64xf32>
    %96 = arith.addf %90, %95 : vector<16x64xf32>
    %c0_64 = arith.constant 0 : index
    %c1_65 = arith.constant 1 : index
    %c4_66 = arith.constant 4 : index
    %97 = vector.load %arg4[%c0_64, %c1_65, %c4_66] : memref<1x20x80xf32, #tpu.memory_space<vmem>>, vector<1x16x64xf32>
    %98 = vector.shape_cast %97 : vector<1x16x64xf32> to vector<16x64xf32>
    %99 = vector.shape_cast %23 : vector<64xf32> to vector<1x64xf32>
    %100 = vector.broadcast %99 : vector<1x64xf32> to vector<16x64xf32>
    %101 = arith.mulf %98, %100 : vector<16x64xf32>
    %102 = arith.addf %96, %101 : vector<16x64xf32>
    %c0_67 = arith.constant 0 : index
    %c1_68 = arith.constant 1 : index
    %c8_69 = arith.constant 8 : index
    %103 = vector.load %arg4[%c0_67, %c1_68, %c8_69] : memref<1x20x80xf32, #tpu.memory_space<vmem>>, vector<1x16x64xf32>
    %104 = vector.shape_cast %103 : vector<1x16x64xf32> to vector<16x64xf32>
    %105 = vector.shape_cast %25 : vector<64xf32> to vector<1x64xf32>
    %106 = vector.broadcast %105 : vector<1x64xf32> to vector<16x64xf32>
    %107 = arith.mulf %104, %106 : vector<16x64xf32>
    %108 = arith.addf %102, %107 : vector<16x64xf32>
    %c0_70 = arith.constant 0 : index
    %c1_71 = arith.constant 1 : index
    %c12_72 = arith.constant 12 : index
    %109 = vector.load %arg4[%c0_70, %c1_71, %c12_72] : memref<1x20x80xf32, #tpu.memory_space<vmem>>, vector<1x16x64xf32>
    %110 = vector.shape_cast %109 : vector<1x16x64xf32> to vector<16x64xf32>
    %111 = vector.shape_cast %27 : vector<64xf32> to vector<1x64xf32>
    %112 = vector.broadcast %111 : vector<1x64xf32> to vector<16x64xf32>
    %113 = arith.mulf %110, %112 : vector<16x64xf32>
    %114 = arith.addf %108, %113 : vector<16x64xf32>
    %c0_73 = arith.constant 0 : index
    %c1_74 = arith.constant 1 : index
    %c16_75 = arith.constant 16 : index
    %115 = vector.load %arg4[%c0_73, %c1_74, %c16_75] : memref<1x20x80xf32, #tpu.memory_space<vmem>>, vector<1x16x64xf32>
    %116 = vector.shape_cast %115 : vector<1x16x64xf32> to vector<16x64xf32>
    %117 = vector.shape_cast %29 : vector<64xf32> to vector<1x64xf32>
    %118 = vector.broadcast %117 : vector<1x64xf32> to vector<16x64xf32>
    %119 = arith.mulf %116, %118 : vector<16x64xf32>
    %120 = arith.addf %114, %119 : vector<16x64xf32>
    %c0_76 = arith.constant 0 : index
    %c2_77 = arith.constant 2 : index
    %c0_78 = arith.constant 0 : index
    %121 = vector.load %arg4[%c0_76, %c2_77, %c0_78] : memref<1x20x80xf32, #tpu.memory_space<vmem>>, vector<1x16x64xf32>
    %122 = vector.shape_cast %121 : vector<1x16x64xf32> to vector<16x64xf32>
    %123 = vector.shape_cast %31 : vector<64xf32> to vector<1x64xf32>
    %124 = vector.broadcast %123 : vector<1x64xf32> to vector<16x64xf32>
    %125 = arith.mulf %122, %124 : vector<16x64xf32>
    %126 = arith.addf %120, %125 : vector<16x64xf32>
    %c0_79 = arith.constant 0 : index
    %c2_80 = arith.constant 2 : index
    %c4_81 = arith.constant 4 : index
    %127 = vector.load %arg4[%c0_79, %c2_80, %c4_81] : memref<1x20x80xf32, #tpu.memory_space<vmem>>, vector<1x16x64xf32>
    %128 = vector.shape_cast %127 : vector<1x16x64xf32> to vector<16x64xf32>
    %129 = vector.shape_cast %33 : vector<64xf32> to vector<1x64xf32>
    %130 = vector.broadcast %129 : vector<1x64xf32> to vector<16x64xf32>
    %131 = arith.mulf %128, %130 : vector<16x64xf32>
    %132 = arith.addf %126, %131 : vector<16x64xf32>
    %c0_82 = arith.constant 0 : index
    %c2_83 = arith.constant 2 : index
    %c8_84 = arith.constant 8 : index
    %133 = vector.load %arg4[%c0_82, %c2_83, %c8_84] : memref<1x20x80xf32, #tpu.memory_space<vmem>>, vector<1x16x64xf32>
    %134 = vector.shape_cast %133 : vector<1x16x64xf32> to vector<16x64xf32>
    %135 = vector.shape_cast %35 : vector<64xf32> to vector<1x64xf32>
    %136 = vector.broadcast %135 : vector<1x64xf32> to vector<16x64xf32>
    %137 = arith.mulf %134, %136 : vector<16x64xf32>
    %138 = arith.addf %132, %137 : vector<16x64xf32>
    %c0_85 = arith.constant 0 : index
    %c2_86 = arith.constant 2 : index
    %c12_87 = arith.constant 12 : index
    %139 = vector.load %arg4[%c0_85, %c2_86, %c12_87] : memref<1x20x80xf32, #tpu.memory_space<vmem>>, vector<1x16x64xf32>
    %140 = vector.shape_cast %139 : vector<1x16x64xf32> to vector<16x64xf32>
    %141 = vector.shape_cast %37 : vector<64xf32> to vector<1x64xf32>
    %142 = vector.broadcast %141 : vector<1x64xf32> to vector<16x64xf32>
    %143 = arith.mulf %140, %142 : vector<16x64xf32>
    %144 = arith.addf %138, %143 : vector<16x64xf32>
    %c0_88 = arith.constant 0 : index
    %c2_89 = arith.constant 2 : index
    %c16_90 = arith.constant 16 : index
    %145 = vector.load %arg4[%c0_88, %c2_89, %c16_90] : memref<1x20x80xf32, #tpu.memory_space<vmem>>, vector<1x16x64xf32>
    %146 = vector.shape_cast %145 : vector<1x16x64xf32> to vector<16x64xf32>
    %147 = vector.shape_cast %39 : vector<64xf32> to vector<1x64xf32>
    %148 = vector.broadcast %147 : vector<1x64xf32> to vector<16x64xf32>
    %149 = arith.mulf %146, %148 : vector<16x64xf32>
    %150 = arith.addf %144, %149 : vector<16x64xf32>
    %c0_91 = arith.constant 0 : index
    %c3_92 = arith.constant 3 : index
    %c0_93 = arith.constant 0 : index
    %151 = vector.load %arg4[%c0_91, %c3_92, %c0_93] : memref<1x20x80xf32, #tpu.memory_space<vmem>>, vector<1x16x64xf32>
    %152 = vector.shape_cast %151 : vector<1x16x64xf32> to vector<16x64xf32>
    %153 = vector.shape_cast %41 : vector<64xf32> to vector<1x64xf32>
    %154 = vector.broadcast %153 : vector<1x64xf32> to vector<16x64xf32>
    %155 = arith.mulf %152, %154 : vector<16x64xf32>
    %156 = arith.addf %150, %155 : vector<16x64xf32>
    %c0_94 = arith.constant 0 : index
    %c3_95 = arith.constant 3 : index
    %c4_96 = arith.constant 4 : index
    %157 = vector.load %arg4[%c0_94, %c3_95, %c4_96] : memref<1x20x80xf32, #tpu.memory_space<vmem>>, vector<1x16x64xf32>
    %158 = vector.shape_cast %157 : vector<1x16x64xf32> to vector<16x64xf32>
    %159 = vector.shape_cast %43 : vector<64xf32> to vector<1x64xf32>
    %160 = vector.broadcast %159 : vector<1x64xf32> to vector<16x64xf32>
    %161 = arith.mulf %158, %160 : vector<16x64xf32>
    %162 = arith.addf %156, %161 : vector<16x64xf32>
    %c0_97 = arith.constant 0 : index
    %c3_98 = arith.constant 3 : index
    %c8_99 = arith.constant 8 : index
    %163 = vector.load %arg4[%c0_97, %c3_98, %c8_99] : memref<1x20x80xf32, #tpu.memory_space<vmem>>, vector<1x16x64xf32>
    %164 = vector.shape_cast %163 : vector<1x16x64xf32> to vector<16x64xf32>
    %165 = vector.shape_cast %45 : vector<64xf32> to vector<1x64xf32>
    %166 = vector.broadcast %165 : vector<1x64xf32> to vector<16x64xf32>
    %167 = arith.mulf %164, %166 : vector<16x64xf32>
    %168 = arith.addf %162, %167 : vector<16x64xf32>
    %c0_100 = arith.constant 0 : index
    %c3_101 = arith.constant 3 : index
    %c12_102 = arith.constant 12 : index
    %169 = vector.load %arg4[%c0_100, %c3_101, %c12_102] : memref<1x20x80xf32, #tpu.memory_space<vmem>>, vector<1x16x64xf32>
    %170 = vector.shape_cast %169 : vector<1x16x64xf32> to vector<16x64xf32>
    %171 = vector.shape_cast %47 : vector<64xf32> to vector<1x64xf32>
    %172 = vector.broadcast %171 : vector<1x64xf32> to vector<16x64xf32>
    %173 = arith.mulf %170, %172 : vector<16x64xf32>
    %174 = arith.addf %168, %173 : vector<16x64xf32>
    %c0_103 = arith.constant 0 : index
    %c3_104 = arith.constant 3 : index
    %c16_105 = arith.constant 16 : index
    %175 = vector.load %arg4[%c0_103, %c3_104, %c16_105] : memref<1x20x80xf32, #tpu.memory_space<vmem>>, vector<1x16x64xf32>
    %176 = vector.shape_cast %175 : vector<1x16x64xf32> to vector<16x64xf32>
    %177 = vector.shape_cast %49 : vector<64xf32> to vector<1x64xf32>
    %178 = vector.broadcast %177 : vector<1x64xf32> to vector<16x64xf32>
    %179 = arith.mulf %176, %178 : vector<16x64xf32>
    %180 = arith.addf %174, %179 : vector<16x64xf32>
    %c0_106 = arith.constant 0 : index
    %c4_107 = arith.constant 4 : index
    %c0_108 = arith.constant 0 : index
    %181 = vector.load %arg4[%c0_106, %c4_107, %c0_108] : memref<1x20x80xf32, #tpu.memory_space<vmem>>, vector<1x16x64xf32>
    %182 = vector.shape_cast %181 : vector<1x16x64xf32> to vector<16x64xf32>
    %183 = vector.shape_cast %51 : vector<64xf32> to vector<1x64xf32>
    %184 = vector.broadcast %183 : vector<1x64xf32> to vector<16x64xf32>
    %185 = arith.mulf %182, %184 : vector<16x64xf32>
    %186 = arith.addf %180, %185 : vector<16x64xf32>
    %c0_109 = arith.constant 0 : index
    %c4_110 = arith.constant 4 : index
    %c4_111 = arith.constant 4 : index
    %187 = vector.load %arg4[%c0_109, %c4_110, %c4_111] : memref<1x20x80xf32, #tpu.memory_space<vmem>>, vector<1x16x64xf32>
    %188 = vector.shape_cast %187 : vector<1x16x64xf32> to vector<16x64xf32>
    %189 = vector.shape_cast %53 : vector<64xf32> to vector<1x64xf32>
    %190 = vector.broadcast %189 : vector<1x64xf32> to vector<16x64xf32>
    %191 = arith.mulf %188, %190 : vector<16x64xf32>
    %192 = arith.addf %186, %191 : vector<16x64xf32>
    %c0_112 = arith.constant 0 : index
    %c4_113 = arith.constant 4 : index
    %c8_114 = arith.constant 8 : index
    %193 = vector.load %arg4[%c0_112, %c4_113, %c8_114] : memref<1x20x80xf32, #tpu.memory_space<vmem>>, vector<1x16x64xf32>
    %194 = vector.shape_cast %193 : vector<1x16x64xf32> to vector<16x64xf32>
    %195 = vector.shape_cast %55 : vector<64xf32> to vector<1x64xf32>
    %196 = vector.broadcast %195 : vector<1x64xf32> to vector<16x64xf32>
    %197 = arith.mulf %194, %196 : vector<16x64xf32>
    %198 = arith.addf %192, %197 : vector<16x64xf32>
    %c0_115 = arith.constant 0 : index
    %c4_116 = arith.constant 4 : index
    %c12_117 = arith.constant 12 : index
    %199 = vector.load %arg4[%c0_115, %c4_116, %c12_117] : memref<1x20x80xf32, #tpu.memory_space<vmem>>, vector<1x16x64xf32>
    %200 = vector.shape_cast %199 : vector<1x16x64xf32> to vector<16x64xf32>
    %201 = vector.shape_cast %57 : vector<64xf32> to vector<1x64xf32>
    %202 = vector.broadcast %201 : vector<1x64xf32> to vector<16x64xf32>
    %203 = arith.mulf %200, %202 : vector<16x64xf32>
    %204 = arith.addf %198, %203 : vector<16x64xf32>
    %c0_118 = arith.constant 0 : index
    %c4_119 = arith.constant 4 : index
    %c16_120 = arith.constant 16 : index
    %205 = vector.load %arg4[%c0_118, %c4_119, %c16_120] : memref<1x20x80xf32, #tpu.memory_space<vmem>>, vector<1x16x64xf32>
    %206 = vector.shape_cast %205 : vector<1x16x64xf32> to vector<16x64xf32>
    %207 = vector.shape_cast %59 : vector<64xf32> to vector<1x64xf32>
    %208 = vector.broadcast %207 : vector<1x64xf32> to vector<16x64xf32>
    %209 = arith.mulf %206, %208 : vector<16x64xf32>
    %210 = arith.addf %204, %209 : vector<16x64xf32>
    %c0_121 = arith.constant 0 : index
    %c0_122 = arith.constant 0 : index
    %c0_123 = arith.constant 0 : index
    %211 = vector.load %arg3[%c0_121, %c0_122, %c0_123] : memref<1x16x64xf32, #tpu.memory_space<vmem>>, vector<1x16x64xf32>
    %212 = vector.shape_cast %211 : vector<1x16x64xf32> to vector<16x64xf32>
    %213 = vector.shape_cast %210 : vector<16x64xf32> to vector<1x16x64xf32>
    tpu.vector_store %arg3[%c0_121, %c0_122, %c0_123], %213 {strides = array<i32>} : memref<1x16x64xf32, #tpu.memory_space<vmem>>, vector<1x16x64xf32>,
    return
  }
  func.func @transform_0(%arg0: i32) -> (i32, i32, i32) {
    %c0_i32 = arith.constant 0 : i32
    %c0_i32_0 = arith.constant 0 : i32
    %c0_i32_1 = arith.constant 0 : i32
    return %arg0, %c0_i32, %c0_i32_0 : i32, i32, i32
  }
  func.func @transform_1(%arg0: i32) -> (i32, i32) {
    %c0_i32 = arith.constant 0 : i32
    %c0_i32_0 = arith.constant 0 : i32
    %c0_i32_1 = arith.constant 0 : i32
    return %c0_i32, %c0_i32_0 : i32, i32
  }
  func.func @transform_2(%arg0: i32) -> (i32, i32, i32) {
    %c0_i32 = arith.constant 0 : i32
    %c0_i32_0 = arith.constant 0 : i32
    %c0_i32_1 = arith.constant 0 : i32
    return %arg0, %c0_i32, %c0_i32_0 : i32, i32, i32
  }
}

</mosaic_0001>

<bundles_post_ra>
// kernel: tpu_custom_call.1
= control target key start
LH: loop header
LB: loop body
LE: loop exit
PB: predicated region body
PF: predicated region fallthrough
CT: control target
= control target key end

     0   :  { %7 = vsyncpa [#allocation4], 0  ;;  %s1253_s0 = inlined_call_operand.hbm [shape: f32[2,16,64], index: 0, kind: input, shape index: {}]   ;;  %s1254_s1 = inlined_call_operand.hbm [shape: f32[25,64], index: 1, kind: input, shape index: {}]   ;;  %s1255_s2 = inlined_call_operand.hbm [shape: f32[2,16,64], index: 2, kind: output, shape index: {}]  }
   0x1   :  { %9 = vsyncpa [#allocation4 + $0x1], 0 }
   0x2   :  { %10 = vsyncpa [#allocation7], 0 }
   0x3   :  { %11 = vsyncpa [#allocation5], 0 }
   0x4   :  { %13 = vsyncpa [#allocation5 + $0x1], 0  ;;  %s977_s9 = smov 0   ;;  %s979_s10 = smov 0  }
   0x5   :  { %s981_s11 = smov 0   ;;  %s983_s12 = smov 0  }
   0x6 LB: > { %s998_s13 = sadd.s32 4294967295, %s947_s12   ;;  %s705_s14 = sadd.s32 4294967294, %s947_s12   ;;  %s947_s12 = sphi %s983_s12, %s1265_s12   ;;  %s943_s11 = sphi %s981_s11, %s1264_s11   ;;  %s939_s10 = sphi %s979_s10, %s1263_s10   ;;  %s935_s9 = sphi %s977_s9, %s1262_s9  }
   0x7   : > { %p39_p0 = scmp.ne.s32.totalorder %s939_s10, %s935_s9  ;;  %p40_p1 = scmp.eq.s32.totalorder %s998_s13, 0 }
   0x8   : > { %p84_p2 = scmp.eq.s32.totalorder %s998_s13, 1  ;;  %p90_p3 = scmp.eq.s32.totalorder %s705_s14, 1 }
   0x9   : > { %p1007_p4 = por %p40_p1, %p39_p0  ;;  %p706_p5 = scmp.ge.s32.totalorder %s947_s12, 1 }
   0xa   : > { %p1012_p6 = por %p90_p3, %p39_p0  ;;  %p97_p7 = scmp.lt.s32.totalorder %s947_s12, 3 }
   0xb   : > { %s108_s19 = sshll.u32 %s1254_s1, 4  ;;  %s949_s21 = smov [#allocation6]   ;;  %s109_s19 = int_to_ptr.hbm [resolvable:$true] %s108_s19 }
   0xc   : > { %p1020_p8 = pnand %p706_p5, %p97_p7  ;;  %s110_s22 = sshll.u32 %s949_s21, 4  ;;  %s111_s22 = int_to_ptr.vmem [resolvable:$true] %s110_s22 }
   0xd   : > { %s1030_s23 = sadd.s32 1, %s947_s12   ;;  %s950_s24 = smov 128  }
   0xe   : > { %p731_p9 = pneg %p1020_p8  ;;  %s951_s25 = smov 8  }
   0xf   : > { %s23_s26 = ssub.s32 %s947_s12, %s1030_s23  ;;  %s26_s27 = sadd.s32 1, %s943_s11 }
  0x10   : > { %p732_p10 = pnand %p731_p9, %p40_p1  ;;  %p24_p12 = scmp.eq.s32.totalorder %s23_s26, 0 }
  0x11   : > { %p33_p13 = scmp.ne.s32.totalorder %s943_s11, %s939_s10  ;;  %p34_p0 = scmp.eq.s32.totalorder %s947_s12, 0 }
  0x12   : > { %734 = dma.hbm_to_vmem [thread:$0]  (!%p732_p10), %s109_s19, 512, %s111_s22, [#allocation7], %s950_s24, %s950_s24, %s951_s25  }
  0x13   : > { %s1042_s28 = scalar_select %p24_p12, %s943_s11, %s26_s27  }
  0x14   : > { %p1046_p3 = por %p84_p2, %p33_p13  ;;  %p744_p5 = scmp.lt.s32.totalorder %s947_s12, 2 }
  0x15   : > { %s124_s30 = sand.u32 1, %s943_s11   ;;  %s721_s3 = sshll.u32 %s947_s12, 4 }
  0x16   : > { %p35_p7 = por %p34_p0, %p33_p13  ;;  %s709_s4 = sshll.u32 %s124_s30, 4 }
  0x17   : > { %s133_s7 = scalar_lea.hbm %s1253_s0, %s721_s3  ;;  %s128_s14 = scalar_lea.vmem [#allocation3], %s709_s4 }
  0x18   : > { %s134_s8 = sshll.u32 %s133_s7, 4  ;;  %s136_s17 = sshll.u32 %s128_s14, 4  ;;  %s135_s8 = int_to_ptr.hbm [resolvable:$true] %s134_s8  ;;  %s137_s17 = int_to_ptr.vmem [resolvable:$true] %s136_s17 }
  0x19   : > { %p1056_p9 = pnand %p744_p5, %p35_p7  ;;  %s125_s19 = scalar_lea.sflag [#allocation4], %s124_s30 }
  0x1a   : > { %s847_s21 = sshra.s32 %s135_s8, 4  ;;  %s854_s3 = scalar_lea.hbm %s1253_s0, 32  ;;  %s848_s21 = int_to_ptr.hbm [resolvable:$true] %s847_s21 }
  0x1b   : > { %s849_s22 = scalar_lea.hbm %s848_s21, 16  ;;  %p851_p10 = pneg %p1056_p9 }
  0x1c   : > { %p850_p2 = scmp.ne.s32.totalorder %s848_s21, %s849_s22  ;;  %p855_p0 = scmp.lt.s32.totalorder %s848_s21, %s1253_s0 }
  0x1d   : > { %p856_p5 = scmp.lt.s32.totalorder %s854_s3, %s849_s22 }
  0x1e   : > { %p852_p12 = pnand %p851_p10, %p850_p2 }
  0x1f   : > { %p857_p7 = por %p856_p5, %p855_p0 }
  0x20   : > { %p853_p13 = pneg %p852_p12 }
  0x22   : > { %p858_p11 = pnand %p857_p7, %p853_p13 }
  0x24   : > { %861 = shalt.err (!%p858_p11)
}
  0x25   : > { %738 = dma.hbm_to_vmem [thread:$0]  (!%p1056_p9), %s135_s8, 256, %s137_s17, %s125_s19, %s950_s24, %s950_s24, %s951_s25  }
  0x26   : > { %148 = sbr.rel (%p1020_p8) target bundleno = 414 (0x19e), region = 28  ;;  %s1076_s30 = sand.u32 (!%p1020_p8), 1, %s939_s10  }
  0x27   : > { %s713_s6 = sshll.u32 (!%p1020_p8), %s1076_s30, 4  ;;  %s151_s7 = scalar_lea.sflag (!%p1020_p8), [#allocation4], %s1076_s30 }
  0x28   : > { %s154_s14 = scalar_lea.vmem (!%p1020_p8), [#allocation3], %s713_s6 }
  0x2b   : > { %922 = dma.done.wait (%p1007_p4), %s151_s7, 256  }
  0x2c   : > { %924 = vsyncadd (%p1007_p4), %s151_s7, 4294967040 }
  0x2d   : > { %926 = dma.done.wait (%p40_p1), [#allocation7], 512  }
  0x2e   : > { %928 = vsyncadd (%p40_p1), [#allocation7], 4294966784  ;;  %v190_v0 = vld [vmem:[%s154_s14] sm:$0xff]  ;;  %s952_s20 = smov 8   ;;  %s953_s24 = smov 4   ;;  %v191_v3 = vld [vmem:[%s154_s14 + $0x8] sm:$0xff] }
  0x2f   : > { %v792_v1 = vld [vmem:[#allocation6 + $0x2] ss:$0 sm:$0xff]  ;;  %194 = vrot.lane.b32.xlu0 %v190_v0, %s952_s20  ;;  %v793_v2 = vld [vmem:[#allocation6 + $0x1] ss:$0 sm:$0xff]  ;;  %v794_v4 = vld [vmem:[#allocation6 + $0x3] ss:$0 sm:$0xff] }
  0x30   : > { %254 = vrot.lane.b32.xlu2 %v792_v1, %s952_s20  ;;  %237 = vrot.lane.b32.xlu1 %v793_v2, %s953_s24  ;;  %v795_v5 = vld [vmem:[#allocation6 + $0xd] ss:$0 sm:$0xff]  ;;  %s954_s15 = smov 12   ;;  %v796_v6 = vld [vmem:[#allocation6 + $0xc] ss:$0 sm:$0xff]  ;;  %s955_s25 = smov 16  }
  0x31   : > { %v797_v7 = vld [vmem:[#allocation6 + $0x4] ss:$0 sm:$0xff]  ;;  %v798_v8 = vld [vmem:[#allocation6 + $0x11] ss:$0 sm:$0xff]  ;;  %v799_v9 = vld [vmem:[#allocation6 + $0x10] ss:$0 sm:$0xff] }
  0x32   : > { %v800_v10 = vld [vmem:[#allocation6 + $0x6] ss:$0 sm:$0xff]  ;;  %v801_v11 = vld [vmem:[#allocation6 + $0x15] ss:$0 sm:$0xff]  ;;  %v802_v12 = vld [vmem:[#allocation6 + $0x13] ss:$0 sm:$0xff] }
  0x33   : > { %v803_v13 = vld [vmem:[#allocation6 + $0x7] ss:$0 sm:$0xff]  ;;  %v804_v14 = vld [vmem:[#allocation6 + $0x18] ss:$0 sm:$0xff]  ;;  %v805_v15 = vld [vmem:[#allocation6 + $0x17] ss:$0 sm:$0xff] }
  0x34   : > { %v806_v16 = vld [vmem:[#allocation6 + $0x8] ss:$0 sm:$0xff]  ;;  %v807_v17 = vld [vmem:[#allocation6 + $0x9] ss:$0 sm:$0xff]  ;;  %v808_v18 = vld [vmem:[#allocation6 + $0xb] ss:$0 sm:$0xff] }
  0x35   : > { %v809_v19 = vld [vmem:[#allocation6 + $0xe] ss:$0 sm:$0xff]  ;;  %v810_v20 = vld [vmem:[#allocation6 + $0x12] ss:$0 sm:$0xff]  ;;  %vm181_vm0 = vcmask 648192   ;;  %vm184_vm1 = vcmask 64512  }
  0x36   : > { %vm187_vm2 = vcmask 654912   ;;  %v956_v21 = vmov 0.0   ;;  %v811_v22 = vld [vmem:[#allocation6 + $0x16] ss:$0 sm:$0xff]  ;;  %vm200_vm3 = vcmask 588864   ;;  %s957_s8 = smov 120  }
  0x37   : > { %196 = vrot.lane.b32.xlu0 %v191_v3, %s952_s20  ;;  %182 = vst.msk [vmem:[#allocation2] sm:$0x3] %vm181_vm0, %v956_v21  ;;  %s958_s17 = smov 124   ;;  %s959_s18 = smov 116   ;;  %vm603_vm4 = vcmask 523264  }
  0x38   : > { %271 = vrot.lane.b32.xlu2 %v794_v4, %s954_s15  ;;  %421 = vrot.lane.b32.xlu1 %v795_v5, %s954_s15  ;;  %183 = vst.msk [vmem:[#allocation2 + $0x12] sm:$0x3] %vm181_vm0, %v956_v21  ;;  %s960_s19 = smov 112   ;;  %s722_s21 = sshll.u32 %s998_s13, 4 }
  0x39   : > { %185 = vst.msk [vmem:[#allocation2 + $0x2] sm:$0xff] %vm184_vm1, %v956_v21  ;;  %s618_s27 = scalar_lea.hbm %s1255_s2, %s722_s21  ;;  %s180_s3 = scalar_lea.vmem [#allocation8], %s713_s6 }
  0x3a   : > { %188 = vst.msk [vmem:[#allocation2 + $0x2] sm:$0xff] %vm187_vm2, %v956_v21  ;;  %s619_s4 = sshll.u32 %s180_s3, 4  ;;  %s621_s5 = sshll.u32 %s618_s27, 4  ;;  %s620_s4 = int_to_ptr.vmem [resolvable:$true] %s619_s4  ;;  %s622_s5 = int_to_ptr.hbm [resolvable:$true] %s621_s5 }
  0x3b   : > { %186 = vst.msk [vmem:[#allocation2 + $0xa] sm:$0xff] %vm184_vm1, %v956_v21  ;;  %s607_s13 = scalar_lea.sflag [#allocation5], %s1076_s30  ;;  %s891_s7 = sshra.s32 %s622_s5, 4  ;;  %s892_s7 = int_to_ptr.hbm [resolvable:$true] %s891_s7 }
  0x3c   : > { %189 = vst.msk [vmem:[#allocation2 + $0xa] sm:$0xff] %vm187_vm2, %v956_v21  ;;  %s893_s14 = scalar_lea.hbm %s892_s7, 16  ;;  %p898_p11 = scmp.lt.s32.totalorder %s892_s7, %s1255_s2 }
  0x3d   : > { %p894_p1 = scmp.ne.s32.totalorder %s892_s7, %s893_s14 }
  0x3f   : > { %404 = vrot.lane.b32.xlu0 %v796_v6, %s952_s20  ;;  %p895_p4 = pnand %p894_p1, %p1046_p3 }
  0x40   : > { %288 = vrot.lane.b32.xlu2 %v797_v7, %s955_s25  ;;  %479 = vrot.lane.b32.xlu1 %v798_v8, %s952_s20 }
  0x41   : > { %p896_p8 = pneg %p895_p4 }
  0x47   : > { %462 = vrot.lane.b32.xlu0 %v799_v9, %s953_s24 }
  0x48   : > { %312 = vrot.lane.b32.xlu2 %v800_v10, %s953_s24  ;;  %537 = vrot.lane.b32.xlu1 %v801_v11, %s953_s24 }
  0x4f   : > { %513 = vrot.lane.b32.xlu0 %v802_v12, %s955_s25 }
  0x50   : > { %329 = vrot.lane.b32.xlu2 %v803_v13, %s952_s20  ;;  %588 = vrot.lane.b32.xlu1 %v804_v14, %s955_s25 }
  0x57   : > { %571 = vrot.lane.b32.xlu0 %v805_v15, %s954_s15 }
  0x58   : > { %346 = vrot.lane.b32.xlu2 %v806_v16, %s954_s15 }
  0x60   : > { %363 = vrot.lane.b32.xlu2 %v807_v17, %s955_s25 }
  0x68   : > { %387 = vrot.lane.b32.xlu2 %v808_v18, %s953_s24 }
  0x70   : > { %438 = vrot.lane.b32.xlu2 %v809_v19, %s955_s25 }
  0x78   : > { %496 = vrot.lane.b32.xlu2 %v810_v20, %s954_s15  ;;  %s897_s15 = scalar_lea.hbm %s1255_s2, 32 }
  0x79   : > { %p899_p9 = scmp.lt.s32.totalorder %s897_s15, %s893_s14 }
  0x7b   : > { %p900_p2 = por %p899_p9, %p898_p11 }
  0x7d   : > { %p901_p10 = pnand %p900_p2, %p896_p8 }
  0x80   : > { %554 = vrot.lane.b32.xlu2 %v811_v22, %s952_s20 }
  0x8a   : > { %v255_v23 = vpop.permute.xlu2 %254 }
  0x92   : > { %v272_v24 = vpop.permute.xlu2 %271 }
  0x9a   : > { %v289_v25 = vpop.permute.xlu2 %288 }
  0xa1   : > { %v195_v26 = vpop.permute.xlu0 %194 }
  0xa2   : > { %201 = vst.msk [vmem:[#allocation2 + $0x2] sm:$0xff] %vm200_vm3, %v195_v26  ;;  %v313_v27 = vpop.permute.xlu2 %312  ;;  %v238_v28 = vpop.permute.xlu1 %237 }
  0xa9   : > { %v1107_v29 = vld [vmem:[#allocation2] sm:$0xff]  ;;  %v197_v30 = vpop.permute.xlu0 %196 }
  0xaa   : > { %v240_v31 = vmul.f32 %v238_v28, %v1107_v29  ;;  %202 = vst.msk [vmem:[#allocation2 + $0xa] sm:$0xff] %vm200_vm3, %v197_v30  ;;  %v330_v32 = vpop.permute.xlu2 %329  ;;  %v257_v33 = vmul.f32 %v255_v23, %v1107_v29  ;;  %v274_v36 = vmul.f32 %v272_v24, %v1107_v29  ;;  %v291_v40 = vmul.f32 %v289_v25, %v1107_v29  ;;  %v1125_v42 = vld [vmem:[#allocation2 + $0x1] sm:$0xff]  ;;  %v422_v4 = vpop.permute.xlu1 %421 }
  0xab   : > { %v315_v43 = vmul.f32 %v313_v27, %v1125_v42  ;;  %v1128_v44 = vld [vmem:[#allocation2 + $0x2] sm:$0xff]  ;;  %v332_v51 = vmul.f32 %v330_v32, %v1125_v42 }
  0xac   : > { %261 = vrot.lane.b32.xlu0 %v257_v33, %s957_s8  ;;  %244 = vrot.lane.b32.xlu1 %v240_v31, %s958_s17  ;;  %v424_v6 = vmul.f32 %v422_v4, %v1128_v44 }
  0xb1   : > { %v1113_v35 = vld [vmem:[#allocation2 + $0x8] sm:$0xff]  ;;  %v405_v50 = vpop.permute.xlu0 %404 }
  0xb2   : > { %v347_v34 = vpop.permute.xlu2 %346  ;;  %v241_v37 = vmul.f32 %v238_v28, %v1113_v35  ;;  %v258_v38 = vmul.f32 %v255_v23, %v1113_v35  ;;  %v275_v41 = vmul.f32 %v272_v24, %v1113_v35  ;;  %v292_v47 = vmul.f32 %v289_v25, %v1113_v35  ;;  %v1135_v48 = vld [vmem:[#allocation2 + $0x9] sm:$0xff]  ;;  %v480_v14 = vpop.permute.xlu1 %479  ;;  %v812_v28 = vld [vmem:[#allocation6] ss:$0 sm:$0xff] }
  0xb3   : > { %v1137_v49 = vld [vmem:[#allocation2 + $0xa] sm:$0xff]  ;;  %v316_v53 = vmul.f32 %v313_v27, %v1135_v48  ;;  %v349_v55 = vmul.f32 %v347_v34, %v1125_v42  ;;  %v333_v56 = vmul.f32 %v330_v32, %v1135_v48  ;;  %v350_v61 = vmul.f32 %v347_v34, %v1135_v48 }
  0xb4   : > { %278 = vrot.lane.b32.xlu0 %v274_v36, %s959_s18  ;;  %246 = vrot.lane.b32.xlu2 %v241_v37, %s958_s17  ;;  %v408_v52 = vmul.f32 %v405_v50, %v1137_v49  ;;  %v1151_v59 = vld [vmem:[#allocation2 + $0xb] sm:$0xff]  ;;  %v1159_v0 = vld [vmem:[#allocation2 + $0x3] sm:$0xff]  ;;  %v407_v7 = vmul.f32 %v405_v50, %v1128_v44  ;;  %v425_v12 = vmul.f32 %v422_v4, %v1137_v49 }
  0xb5   : > { %263 = vrot.lane.b32.xlu1 %v258_v38, %s957_s8  ;;  %v1173_v10 = vld [vmem:[#allocation2 + $0x4] sm:$0xff]  ;;  %v482_v16 = vmul.f32 %v480_v14, %v1159_v0  ;;  %v1182_v17 = vld [vmem:[#allocation2 + $0xc] sm:$0xff]  ;;  %v483_v21 = vmul.f32 %v480_v14, %v1151_v59  ;;  %v231_v32 = vmul.f32 %v812_v28, %v1107_v29 }
  0xb9   : > { %v463_v58 = vpop.permute.xlu0 %462 }
  0xba   : > { %v364_v39 = vpop.permute.xlu2 %363  ;;  %v466_v62 = vmul.f32 %v463_v58, %v1151_v59  ;;  %v465_v18 = vmul.f32 %v463_v58, %v1159_v0  ;;  %v538_v22 = vpop.permute.xlu1 %537 }
  0xbb   : > { %v366_v60 = vmul.f32 %v364_v39, %v1125_v42  ;;  %v367_v2 = vmul.f32 %v364_v39, %v1135_v48  ;;  %v540_v23 = vmul.f32 %v538_v22, %v1173_v10  ;;  %v541_v26 = vmul.f32 %v538_v22, %v1182_v17 }
  0xbc   : > { %295 = vrot.lane.b32.xlu0 %v291_v40, %s960_s19  ;;  %v232_v40 = vmul.f32 %v812_v28, %v1113_v35 }
  0xbd   : > { %280 = vrot.lane.b32.xlu1 %v275_v41, %s959_s18 }
  0xc1   : > { %v514_v5 = vpop.permute.xlu0 %513 }
  0xc2   : > { %v388_v45 = vpop.permute.xlu2 %387  ;;  %v517_v8 = vmul.f32 %v514_v5, %v1151_v59  ;;  %v516_v24 = vmul.f32 %v514_v5, %v1159_v0  ;;  %v589_v27 = vpop.permute.xlu1 %588  ;;  %v814_v5 = vld [vmem:[#allocation6 + $0xa] ss:$0 sm:$0xff] }
  0xc3   : > { %v390_v46 = vmul.f32 %v388_v45, %v1128_v44  ;;  %v391_v1 = vmul.f32 %v388_v45, %v1137_v49  ;;  %v591_v30 = vmul.f32 %v589_v27, %v1173_v10  ;;  %v592_v38 = vmul.f32 %v589_v27, %v1182_v17 }
  0xc4   : > { %319 = vrot.lane.b32.xlu0 %v315_v43, %s958_s17 }
  0xc5   : > { %297 = vrot.lane.b32.xlu1 %v292_v47, %s960_s19  ;;  %394 = vrot.lane.b32.xlu2 %v390_v46, %s958_s17  ;;  %v813_v47 = vld [vmem:[#allocation6 + $0x5] ss:$0 sm:$0xff] }
  0xc6   : > { %v307_v35 = vmul.f32 %v813_v47, %v1135_v48 }
  0xc9   : > { %v572_v15 = vpop.permute.xlu0 %571 }
  0xca   : > { %v439_v54 = vpop.permute.xlu2 %438  ;;  %v575_v19 = vmul.f32 %v572_v15, %v1182_v17  ;;  %v574_v31 = vmul.f32 %v572_v15, %v1173_v10 }
  0xcb   : > { %v441_v57 = vmul.f32 %v439_v54, %v1128_v44  ;;  %v442_v11 = vmul.f32 %v439_v54, %v1137_v49 }
  0xcc   : > { %336 = vrot.lane.b32.xlu0 %v332_v51, %s957_s8 }
  0xcd   : > { %321 = vrot.lane.b32.xlu1 %v316_v53, %s958_s17  ;;  %413 = vrot.lane.b32.xlu2 %v408_v52, %s957_s8  ;;  %v306_v53 = vmul.f32 %v813_v47, %v1125_v42  ;;  %v381_v42 = vmul.f32 %v814_v5, %v1128_v44 }
  0xd2   : > { %v497_v63 = vpop.permute.xlu2 %496 }
  0xd3   : > { %v499_v3 = vmul.f32 %v497_v63, %v1159_v0  ;;  %v500_v20 = vmul.f32 %v497_v63, %v1151_v59 }
  0xd4   : > { %353 = vrot.lane.b32.xlu0 %v349_v55, %s959_s18 }
  0xd5   : > { %338 = vrot.lane.b32.xlu1 %v333_v56, %s957_s8  ;;  %445 = vrot.lane.b32.xlu2 %v441_v57, %s960_s19 }
  0xda   : > { %v555_v9 = vpop.permute.xlu2 %554 }
  0xdb   : > { %v557_v13 = vmul.f32 %v555_v9, %v1173_v10  ;;  %v558_v25 = vmul.f32 %v555_v9, %v1182_v17 }
  0xdc   : > { %370 = vrot.lane.b32.xlu0 %v366_v60, %s960_s19 }
  0xdd   : > { %355 = vrot.lane.b32.xlu1 %v350_v61, %s959_s18  ;;  %471 = vrot.lane.b32.xlu2 %v466_v62, %s958_s17 }
  0xe4   : > { %396 = vrot.lane.b32.xlu0 %v391_v1, %s958_s17 }
  0xe5   : > { %372 = vrot.lane.b32.xlu1 %v367_v2, %s960_s19  ;;  %503 = vrot.lane.b32.xlu2 %v499_v3, %s959_s18 }
  0xec   : > { %428 = vrot.lane.b32.xlu0 %v424_v6, %s959_s18 }
  0xed   : > { %411 = vrot.lane.b32.xlu1 %v407_v7, %s957_s8  ;;  %522 = vrot.lane.b32.xlu2 %v517_v8, %s960_s19 }
  0xf4   : > { %447 = vrot.lane.b32.xlu0 %v442_v11, %s960_s19 }
  0xf5   : > { %430 = vrot.lane.b32.xlu1 %v425_v12, %s959_s18  ;;  %561 = vrot.lane.b32.xlu2 %v557_v13, %s957_s8 }
  0xfc   : > { %486 = vrot.lane.b32.xlu0 %v482_v16, %s957_s8 }
  0xfd   : > { %469 = vrot.lane.b32.xlu1 %v465_v18, %s958_s17  ;;  %580 = vrot.lane.b32.xlu2 %v575_v19, %s959_s18  ;;  %v382_v18 = vmul.f32 %v814_v5, %v1137_v49 }
 0x104   : > { %505 = vrot.lane.b32.xlu0 %v500_v20, %s959_s18 }
 0x105   : > { %488 = vrot.lane.b32.xlu1 %v483_v21, %s957_s8 }
 0x10c   : > { %544 = vrot.lane.b32.xlu0 %v540_v23, %s958_s17 }
 0x10d   : > { %520 = vrot.lane.b32.xlu1 %v516_v24, %s960_s19 }
 0x10e   : > { %v247_v39 = vpop.permute.xlu2 %246 }
 0x10f   : > { %v251_v41 = vadd.f32 %v247_v39, %v232_v40 }
 0x114   : > { %563 = vrot.lane.b32.xlu0 %v558_v25, %s957_s8 }
 0x115   : > { %546 = vrot.lane.b32.xlu1 %v541_v26, %s958_s17  ;;  %v815_v26 = vld [vmem:[#allocation6 + $0xf] ss:$0 sm:$0xff] }
 0x116   : > { %v456_v28 = vmul.f32 %v815_v26, %v1159_v0  ;;  %v816_v0 = vld [vmem:[#allocation6 + $0x14] ss:$0 sm:$0xff] }
 0x11c   : > { %595 = vrot.lane.b32.xlu0 %v591_v30, %s960_s19 }
 0x11d   : > { %578 = vrot.lane.b32.xlu1 %v574_v31, %s959_s18 }
 0x11e   : > { %v262_v33 = vpop.permute.xlu0 %261  ;;  %v245_v34 = vpop.permute.xlu1 %244 }
 0x11f   : > { %v250_v36 = vadd.f32 %v245_v34, %v231_v32  ;;  %v395_v2 = vpop.permute.xlu2 %394 }
 0x121   : > { %v267_v37 = vadd.f32 %v262_v33, %v250_v36 }
 0x125   : > { %597 = vrot.lane.b32.xlu1 %v592_v38, %s960_s19  ;;  %v457_v38 = vmul.f32 %v815_v26, %v1151_v59 }
 0x126   : > { %v279_v43 = vpop.permute.xlu0 %278 }
 0x127   : > { %v264_v45 = vpop.permute.xlu1 %263  ;;  %v284_v50 = vadd.f32 %v279_v43, %v267_v37  ;;  %v414_v13 = vpop.permute.xlu2 %413 }
 0x128   : > { %v268_v46 = vadd.f32 %v264_v45, %v251_v41 }
 0x12e   : > { %v296_v51 = vpop.permute.xlu0 %295 }
 0x12f   : > { %v301_v52 = vadd.f32 %v296_v51, %v284_v50  ;;  %v281_v29 = vpop.permute.xlu1 %280  ;;  %v446_v21 = vpop.permute.xlu2 %445 }
 0x130   : > { %v285_v55 = vadd.f32 %v281_v29, %v268_v46 }
 0x131   : > { %v308_v54 = vadd.f32 %v306_v53, %v301_v52 }
 0x136   : > { %v320_v56 = vpop.permute.xlu0 %319 }
 0x137   : > { %v298_v57 = vpop.permute.xlu1 %297  ;;  %v325_v3 = vadd.f32 %v320_v56, %v308_v54  ;;  %v472_v34 = vpop.permute.xlu2 %471 }
 0x138   : > { %v302_v58 = vadd.f32 %v298_v57, %v285_v55  ;;  %v532_v55 = vmul.f32 %v816_v0, %v1182_v17 }
 0x13a   : > { %v309_v60 = vadd.f32 %v307_v35, %v302_v58  ;;  %v531_v35 = vmul.f32 %v816_v0, %v1173_v10 }
 0x13e   : > { %v337_v61 = vpop.permute.xlu0 %336 }
 0x13f   : > { %v322_v62 = vpop.permute.xlu1 %321  ;;  %v342_v4 = vadd.f32 %v337_v61, %v325_v3  ;;  %v504_v43 = vpop.permute.xlu2 %503 }
 0x140   : > { %v326_v12 = vadd.f32 %v322_v62, %v309_v60 }
 0x146   : > { %v354_v63 = vpop.permute.xlu0 %353 }
 0x147   : > { %v339_v1 = vpop.permute.xlu1 %338  ;;  %v359_v6 = vadd.f32 %v354_v63, %v342_v4  ;;  %v523_v53 = vpop.permute.xlu2 %522 }
 0x148   : > { %v343_v14 = vadd.f32 %v339_v1, %v326_v12 }
 0x14e   : > { %v371_v7 = vpop.permute.xlu0 %370 }
 0x14f   : > { %v376_v8 = vadd.f32 %v371_v7, %v359_v6  ;;  %v356_v9 = vpop.permute.xlu1 %355 }
 0x150   : > { %v360_v48 = vadd.f32 %v356_v9, %v343_v14 }
 0x151   : > { %v383_v11 = vadd.f32 %v381_v42, %v376_v8 }
 0x153   : > { %v400_v23 = vadd.f32 %v395_v2, %v383_v11  ;;  %v562_v2 = vpop.permute.xlu2 %561 }
 0x156   : > { %v397_v15 = vpop.permute.xlu0 %396 }
 0x157   : > { %v373_v16 = vpop.permute.xlu1 %372 }
 0x158   : > { %v377_v19 = vadd.f32 %v373_v16, %v360_v48 }
 0x15a   : > { %v384_v20 = vadd.f32 %v382_v18, %v377_v19 }
 0x15b   : > { %v581_v10 = vpop.permute.xlu2 %580 }
 0x15c   : > { %v401_v27 = vadd.f32 %v397_v15, %v384_v20 }
 0x15e   : > { %v429_v22 = vpop.permute.xlu0 %428  ;;  %v418_v32 = vadd.f32 %v414_v13, %v401_v27 }
 0x15f   : > { %v412_v24 = vpop.permute.xlu1 %411 }
 0x160   : > { %v417_v25 = vadd.f32 %v412_v24, %v400_v23 }
 0x162   : > { %v434_v44 = vadd.f32 %v429_v22, %v417_v25 }
 0x164   : > { %v451_v30 = vadd.f32 %v446_v21, %v434_v44 }
 0x166   : > { %v448_v31 = vpop.permute.xlu0 %447  ;;  %v458_v33 = vadd.f32 %v456_v28, %v451_v30 }
 0x167   : > { %v431_v36 = vpop.permute.xlu1 %430 }
 0x168   : > { %v435_v37 = vadd.f32 %v431_v36, %v418_v32 }
 0x16a   : > { %v452_v49 = vadd.f32 %v448_v31, %v435_v37 }
 0x16c   : > { %v459_v39 = vadd.f32 %v457_v38, %v452_v49 }
 0x16e   : > { %v487_v40 = vpop.permute.xlu0 %486  ;;  %v476_v47 = vadd.f32 %v472_v34, %v459_v39 }
 0x16f   : > { %v470_v41 = vpop.permute.xlu1 %469 }
 0x170   : > { %v475_v45 = vadd.f32 %v470_v41, %v458_v33 }
 0x172   : > { %v492_v52 = vadd.f32 %v487_v40, %v475_v45 }
 0x174   : > { %v509_v57 = vadd.f32 %v504_v43, %v492_v52 }
 0x176   : > { %v506_v46 = vpop.permute.xlu0 %505 }
 0x177   : > { %v489_v50 = vpop.permute.xlu1 %488 }
 0x178   : > { %v493_v51 = vadd.f32 %v489_v50, %v476_v47 }
 0x17a   : > { %v510_v29 = vadd.f32 %v506_v46, %v493_v51 }
 0x17c   : > { %v527_v54 = vadd.f32 %v523_v53, %v510_v29 }
 0x17e   : > { %v545_v56 = vpop.permute.xlu0 %544  ;;  %v534_v59 = vadd.f32 %v532_v55, %v527_v54 }
 0x17f   : > { %v521_v58 = vpop.permute.xlu1 %520 }
 0x180   : > { %v526_v60 = vadd.f32 %v521_v58, %v509_v57 }
 0x182   : > { %v533_v61 = vadd.f32 %v531_v35, %v526_v60 }
 0x184   : > { %v550_v1 = vadd.f32 %v545_v56, %v533_v61 }
 0x186   : > { %v564_v62 = vpop.permute.xlu0 %563  ;;  %v567_v4 = vadd.f32 %v562_v2, %v550_v1 }
 0x187   : > { %v547_v63 = vpop.permute.xlu1 %546 }
 0x188   : > { %v551_v3 = vadd.f32 %v547_v63, %v534_v59 }
 0x18a   : > { %v568_v17 = vadd.f32 %v564_v62, %v551_v3 }
 0x18c   : > { %v585_v8 = vadd.f32 %v581_v10, %v568_v17 }
 0x18e   : > { %v596_v7 = vpop.permute.xlu0 %595 }
 0x18f   : > { %v579_v5 = vpop.permute.xlu1 %578 }
 0x190   : > { %v584_v6 = vadd.f32 %v579_v5, %v567_v4 }
 0x192   : > { %v601_v42 = vadd.f32 %v596_v7, %v584_v6 }
 0x194   : > { %604 = vst.msk [vmem:[%s180_s3] sm:$0xff] %vm603_vm4, %v601_v42 }
 0x197   : > { %v598_v9 = vpop.permute.xlu1 %597 }
 0x198   : > { %v602_v11 = vadd.f32 %v598_v9, %v585_v8 }
 0x19a   : > { %605 = vst.msk [vmem:[%s180_s3 + $0x8] sm:$0xff] %vm603_vm4, %v602_v11 }
 0x19b   : > { %904 = shalt.err (!%p901_p10)
}
 0x19c   : > { %s961_s30 = smov 128  }
 0x19d   : > { %729 = dma.vmem_to_hbm [thread:$0]  (%p1046_p3), %s620_s4, 256, %s622_s5, %s607_s13, %s961_s30, %s961_s30, %s952_s20  }
 0x19e PF: > { %s636_s17 = sand.u32 1, %s935_s9   ;;  %p1261_p12 = scmp.ge.s32.totalorder %s947_s12, 2 }
 0x19f   : > { %s637_s18 = scalar_lea.sflag [#allocation5], %s636_s17 }
 0x1a0   : > { %p740_p13 = pnand %p1261_p12, %p1012_p6 }
 0x1a2   : > { %p741_p0 = pneg %p740_p13 }
 0x1a4   : > { %930 = dma.done.wait (%p741_p0), %s637_s18, 256  }
 0x1a5   : > { %932 = vsyncadd (%p741_p0), %s637_s18, 4294967040  ;;  %p16_p5 = scmp.ge.s32.totalorder %s1030_s23, 4   ;;  %s1262_s9 = smov %s939_s10 }
 0x1a6   : > { %s1263_s10 = smov %s943_s11  ;;  %s1264_s11 = smov %s1042_s28 }
 0x1a7   : > { %s1265_s12 = smov %s1030_s23  ;;  %18 = sbr.rel (!%p16_p5) target bundleno = 6 (0x6), region = 77 }
 0x1ac   :  { %643 = vsyncpa [#allocation4], 1 }
 0x1ad   :  { %645 = vsyncpa [#allocation4 + $0x1], 1 }
 0x1ae   :  { %646 = vsyncpa [#allocation7], 1 }
 0x1af   :  { %647 = vsyncpa [#allocation5], 1 }
 0x1b0   :  { %649 = vsyncpa [#allocation5 + $0x1], 1 }

</bundles_post_ra>
